<compile_context>
chip_gen: v5e
topology: v5e:2x2
jax: 0.10.0
libtpu: 0.0.40
codegen_flags: <defaults>
</compile_context>

<pallas_src>
import math
from functools import partial

import jax
import jax.numpy as jnp
from jax.experimental import pallas as pl
from jax.experimental.pallas import tpu as pltpu

_LANE = 128
_SUBLANE = 8


def _gcn_kernel(x_ref, scale_ref, w_ref, b_ref, o_ref, *, c_in, c_out, tb):
    # x_ref:     (TB, C_in,  S, 128)  VMEM  lane/sublane-dense input tile
    # scale_ref: (S, 128)             VMEM  diag(adj) expanded over positions (f32)
    # w_ref:     (C_in, C_out)        SMEM  weight (scalar reads)
    # b_ref:     (C_out,)             SMEM  bias   (scalar reads)
    # o_ref:     (TB, C_out, S, 128)  VMEM  lane/sublane-dense output tile
    scale = scale_ref[...].astype(jnp.float32)           # (S, 128), hoisted
    for t in range(tb):                                   # static, short
        # Pre-scale by diag(adj): diag_n * sum_c x*W == sum_c (diag_n*x)*W.
        x = x_ref[t].astype(jnp.float32) * scale          # (C_in, S, 128), f32 accum
        for j in range(c_out):                            # static, tiny
            acc = w_ref[0, j] * x[0]                      # scalar splat * dense plane
            for c in range(1, c_in):                      # static, tiny
                acc = acc + w_ref[c, j] * x[c]
            # Single fused store per (t, j) plane: unmasked 128-lane vst.
            o_ref[t, j] = (acc + b_ref[j]).astype(o_ref.dtype)


def _plan_tiles(B, C_in, C_out, R, itemsize):
    """Pick (TB, S, grid, vmem_limit): a few MiB of traffic per step, double-buffered
    footprint well inside every generation's VMEM (incl. v7x's 64 MiB)."""
    try:
        vmem_cap = int(pltpu.get_tpu_info().vmem_capacity_bytes)
    except Exception:
        vmem_cap = 64 * 1024 * 1024            # conservative: v7x per-TC physical VMEM
    target_step_bytes = max(256 * 1024, min(4 * 1024 * 1024, vmem_cap // 12))

    # Bytes per sublane-group row (128 lanes) for one batch element: x + out + scale.
    row_bytes = (C_in + C_out) * _LANE * itemsize + _LANE * 4
    s_budget = max(_SUBLANE, target_step_bytes // row_bytes)

    if R <= s_budget:
        # Whole position axis fits in one block; widen the batch block instead.
        S = R
        per_b_bytes = (C_in + C_out) * S * _LANE * itemsize
        tb_budget = max(1, min(int(target_step_bytes // max(per_b_bytes, 1)),
                               512 // max(C_out, 1)))     # cap static unroll size
        TB = 1
        for d in range(1, B + 1):                          # TB divides B: no partial
            if B % d == 0 and d <= tb_budget:              # batch blocks needed
                TB = d
        grid_b, grid_l = B // TB, 1
    else:
        TB = 1
        S = max(_SUBLANE, (int(s_budget) // _SUBLANE) * _SUBLANE)  # multiple of 8
        for cand in range(S, _SUBLANE - 1, -_SUBLANE):     # prefer S that divides R
            if R % cand == 0:
                S = cand
                break
        grid_b, grid_l = B, int(pl.cdiv(R, S))             # clipped final block is OK

    # Make sure both v7x TensorCores get fed / the pipeline has >= 2 stages.
    if grid_b * grid_l < 2:
        if B >= 2:
            TB = max(d for d in range(1, B) if B % d == 0)  # largest proper divisor
            grid_b = B // TB
        elif R >= 2 * _SUBLANE:
            S = max(_SUBLANE, (int(pl.cdiv(R, 2)) // _SUBLANE) * _SUBLANE)
            grid_l = int(pl.cdiv(R, S))

    # vmem limit from the actual double-buffered footprint (+ headroom), capped
    # so it is safe on v7x (64 MiB physical VMEM).
    step_bytes = (TB * (C_in + C_out) * S * itemsize + S * 4) * _LANE
    vmem_limit = int(min(max(2 * step_bytes + (2 << 20), 16 << 20), 48 << 20))
    return TB, S, (grid_b, grid_l), vmem_limit


def graph_convolution(x, adj, weight, bias=None):
    """x: (B, C_in, N, I); adj: (N, N); weight: (C_in, C_out); bias: (C_out,) or None."""
    B, C_in, N, I = x.shape
    C_out = weight.shape[1]
    P = N * I

    # diag(adj) expanded over the spatial axis; row-major (N, I) -> (N*I) matches
    # the reshape of x below.  Kept in f32 for accumulation precision.
    scale = jnp.repeat(jnp.diagonal(adj).astype(jnp.float32), I)          # (P,)

    # Pad the position axis to a multiple of 128 lanes so it repacks as (R, 128):
    # positions fill both sublanes and lanes -> dense vregs / VMEM tiles.
    P_pad = int(pl.cdiv(P, _LANE)) * _LANE
    x3 = x.reshape(B, C_in, P)                                            # free reshape
    if P_pad != P:
        x3 = jnp.pad(x3, ((0, 0), (0, 0), (0, P_pad - P)))
        scale = jnp.pad(scale, (0, P_pad - P))
    R = P_pad // _LANE
    x4 = x3.reshape(B, C_in, R, _LANE)
    scale2 = scale.reshape(R, _LANE)

    w_smem = weight.astype(jnp.float32)                                   # (C_in, C_out)
    if bias is None:
        b_smem = jnp.zeros((C_out,), jnp.float32)
    else:
        b_smem = bias.astype(jnp.float32).reshape(C_out)

    TB, S, grid, vmem_limit = _plan_tiles(B, C_in, C_out, R, jnp.dtype(x.dtype).itemsize)

    out4 = pl.pallas_call(
        partial(_gcn_kernel, c_in=C_in, c_out=C_out, tb=TB),
        out_shape=jax.ShapeDtypeStruct((B, C_out, R, _LANE), x.dtype),
        grid_spec=pltpu.PrefetchScalarGridSpec(
            num_scalar_prefetch=0,
            grid=grid,
            in_specs=[
                pl.BlockSpec((TB, C_in, S, _LANE), lambda b, l: (b, 0, l, 0)),  # x tile
                pl.BlockSpec((S, _LANE), lambda b, l: (l, 0)),                  # diag row
                pl.BlockSpec(memory_space=pltpu.MemorySpace.SMEM),              # weight
                pl.BlockSpec(memory_space=pltpu.MemorySpace.SMEM),              # bias
            ],
            out_specs=pl.BlockSpec((TB, C_out, S, _LANE), lambda b, l: (b, 0, l, 0)),
        ),
        compiler_params=pltpu.CompilerParams(
            dimension_semantics=("parallel", "parallel"),
            vmem_limit_bytes=vmem_limit,
        ),
    )(x4, scale2, w_smem, b_smem)

    # Back to the PyTorch output layout (B, C_out, N, I); pad slice-off + reshape.
    return out4.reshape(B, C_out, P_pad)[:, :, :P].reshape(B, C_out, N, I)


def _reference(x, adj, weight, bias):
    support = jnp.einsum("bcni,cj->bjni", x, weight)
    out = jnp.einsum("n,bmnc->bmnc", jnp.diagonal(adj), support)
    if bias is not None:
        out = out + bias[None, :, None, None]
    return out


if __name__ == "__main__":
    key = jax.random.PRNGKey(0)
    k_x, k_adj, k_w, k_b = jax.random.split(key, 4)

    B, C_in, N, I = 2, 4, 16, 16      # batch, in_features, nodes, spatial
    C_out = 6                         # out_features

    x = jax.random.normal(k_x, (B, C_in, N, I), dtype=jnp.float32)
    adj = jax.random.normal(k_adj, (N, N), dtype=jnp.float32)

    # Deterministic parameter init mirroring reset_parameters(): U(-stdv, stdv).
    stdv = 1.0 / math.sqrt(C_out)
    weight = jax.random.uniform(k_w, (C_in, C_out), minval=-stdv, maxval=stdv,
                                dtype=jnp.float32)
    bias = jax.random.uniform(k_b, (C_out,), minval=-stdv, maxval=stdv,
                              dtype=jnp.float32)

    out = graph_convolution(x, adj, weight, bias)
    out = jax.block_until_ready(out)

    ref = _reference(x, adj, weight, bias)
    assert out.shape == (B, C_out, N, I)
    assert jnp.allclose(out, ref, atol=1e-5, rtol=1e-5)

    print("KERNEL_OK")
</pallas_src>

<mosaic_0001>
module attributes {stable_mosaic.version = 11 : i64} {
  func.func @_gcn_kernel(%arg0: i32, %arg1: i32, %arg2: memref<1x4x2x128xf32, #tpu.memory_space<vmem>>, %arg3: memref<2x128xf32, #tpu.memory_space<vmem>>, %arg4: memref<4x6xf32, #tpu.memory_space<smem>>, %arg5: memref<6xf32, #tpu.memory_space<smem>>, %arg6: memref<1x6x2x128xf32, #tpu.memory_space<vmem>>) attributes {dimension_semantics = [#tpu.dimension_semantics<parallel>, #tpu.dimension_semantics<parallel>], iteration_bounds = array<i64: 2, 1>, scalar_prefetch = 0 : i64, scratch_operands = 0 : i64, tpu.core_type = #tpu.core_type<tc>, window_params = [{transform_indices = @transform_0, window_bounds = array<i64: 1, 4, 2, 128>}, {transform_indices = @transform_1, window_bounds = array<i64: 2, 128>}, {transform_indices = @transform_2, window_bounds = array<i64: 4, 6>}, {transform_indices = @transform_3, window_bounds = array<i64: 6>}, {transform_indices = @transform_4, window_bounds = array<i64: 1, 6, 2, 128>}]} {
    %c0 = arith.constant 0 : index
    %c0_0 = arith.constant 0 : index
    %0 = vector.load %arg3[%c0, %c0_0] : memref<2x128xf32, #tpu.memory_space<vmem>>, vector<2x128xf32>
    %c0_1 = arith.constant 0 : index
    %c0_2 = arith.constant 0 : index
    %c0_3 = arith.constant 0 : index
    %c0_4 = arith.constant 0 : index
    %1 = vector.load %arg2[%c0_1, %c0_2, %c0_3, %c0_4] : memref<1x4x2x128xf32, #tpu.memory_space<vmem>>, vector<1x4x2x128xf32>
    %2 = vector.shape_cast %1 : vector<1x4x2x128xf32> to vector<4x2x128xf32>
    %3 = vector.shape_cast %0 : vector<2x128xf32> to vector<1x2x128xf32>
    %4 = vector.broadcast %3 : vector<1x2x128xf32> to vector<4x2x128xf32>
    %5 = arith.mulf %2, %4 : vector<4x2x128xf32>
    %c0_5 = arith.constant 0 : index
    %c0_6 = arith.constant 0 : index
    %6 = memref.load %arg4[%c0_5, %c0_6] : memref<4x6xf32, #tpu.memory_space<smem>>
    %7 = vector.extract_strided_slice %5 {offsets = [0, 0, 0], sizes = [1, 2, 128], strides = [1, 1, 1]} : vector<4x2x128xf32> to vector<1x2x128xf32>
    %8 = vector.shape_cast %7 : vector<1x2x128xf32> to vector<2x128xf32>
    %9 = vector.broadcast %6 : f32 to vector<2x128xf32>
    %10 = arith.mulf %9, %8 : vector<2x128xf32>
    %c1 = arith.constant 1 : index
    %c0_7 = arith.constant 0 : index
    %11 = memref.load %arg4[%c1, %c0_7] : memref<4x6xf32, #tpu.memory_space<smem>>
    %12 = vector.extract_strided_slice %5 {offsets = [1, 0, 0], sizes = [1, 2, 128], strides = [1, 1, 1]} : vector<4x2x128xf32> to vector<1x2x128xf32>
    %13 = vector.shape_cast %12 : vector<1x2x128xf32> to vector<2x128xf32>
    %14 = vector.broadcast %11 : f32 to vector<2x128xf32>
    %15 = arith.mulf %14, %13 : vector<2x128xf32>
    %16 = arith.addf %10, %15 : vector<2x128xf32>
    %c2 = arith.constant 2 : index
    %c0_8 = arith.constant 0 : index
    %17 = memref.load %arg4[%c2, %c0_8] : memref<4x6xf32, #tpu.memory_space<smem>>
    %18 = vector.extract_strided_slice %5 {offsets = [2, 0, 0], sizes = [1, 2, 128], strides = [1, 1, 1]} : vector<4x2x128xf32> to vector<1x2x128xf32>
    %19 = vector.shape_cast %18 : vector<1x2x128xf32> to vector<2x128xf32>
    %20 = vector.broadcast %17 : f32 to vector<2x128xf32>
    %21 = arith.mulf %20, %19 : vector<2x128xf32>
    %22 = arith.addf %16, %21 : vector<2x128xf32>
    %c3 = arith.constant 3 : index
    %c0_9 = arith.constant 0 : index
    %23 = memref.load %arg4[%c3, %c0_9] : memref<4x6xf32, #tpu.memory_space<smem>>
    %24 = vector.extract_strided_slice %5 {offsets = [3, 0, 0], sizes = [1, 2, 128], strides = [1, 1, 1]} : vector<4x2x128xf32> to vector<1x2x128xf32>
    %25 = vector.shape_cast %24 : vector<1x2x128xf32> to vector<2x128xf32>
    %26 = vector.broadcast %23 : f32 to vector<2x128xf32>
    %27 = arith.mulf %26, %25 : vector<2x128xf32>
    %28 = arith.addf %22, %27 : vector<2x128xf32>
    %c0_10 = arith.constant 0 : index
    %29 = memref.load %arg5[%c0_10] : memref<6xf32, #tpu.memory_space<smem>>
    %30 = vector.broadcast %29 : f32 to vector<2x128xf32>
    %31 = arith.addf %28, %30 : vector<2x128xf32>
    %c0_11 = arith.constant 0 : index
    %c0_12 = arith.constant 0 : index
    %c0_13 = arith.constant 0 : index
    %c0_14 = arith.constant 0 : index
    %32 = vector.load %arg6[%c0_11, %c0_12, %c0_13, %c0_14] : memref<1x6x2x128xf32, #tpu.memory_space<vmem>>, vector<1x1x2x128xf32>
    %33 = vector.shape_cast %32 : vector<1x1x2x128xf32> to vector<2x128xf32>
    %34 = vector.shape_cast %31 : vector<2x128xf32> to vector<1x1x2x128xf32>
    tpu.vector_store %arg6[%c0_11, %c0_12, %c0_13, %c0_14], %34 {strides = array<i32>} : memref<1x6x2x128xf32, #tpu.memory_space<vmem>>, vector<1x1x2x128xf32>,
    %c0_15 = arith.constant 0 : index
    %c1_16 = arith.constant 1 : index
    %35 = memref.load %arg4[%c0_15, %c1_16] : memref<4x6xf32, #tpu.memory_space<smem>>
    %36 = vector.extract_strided_slice %5 {offsets = [0, 0, 0], sizes = [1, 2, 128], strides = [1, 1, 1]} : vector<4x2x128xf32> to vector<1x2x128xf32>
    %37 = vector.shape_cast %36 : vector<1x2x128xf32> to vector<2x128xf32>
    %38 = vector.broadcast %35 : f32 to vector<2x128xf32>
    %39 = arith.mulf %38, %37 : vector<2x128xf32>
    %c1_17 = arith.constant 1 : index
    %c1_18 = arith.constant 1 : index
    %40 = memref.load %arg4[%c1_17, %c1_18] : memref<4x6xf32, #tpu.memory_space<smem>>
    %41 = vector.extract_strided_slice %5 {offsets = [1, 0, 0], sizes = [1, 2, 128], strides = [1, 1, 1]} : vector<4x2x128xf32> to vector<1x2x128xf32>
    %42 = vector.shape_cast %41 : vector<1x2x128xf32> to vector<2x128xf32>
    %43 = vector.broadcast %40 : f32 to vector<2x128xf32>
    %44 = arith.mulf %43, %42 : vector<2x128xf32>
    %45 = arith.addf %39, %44 : vector<2x128xf32>
    %c2_19 = arith.constant 2 : index
    %c1_20 = arith.constant 1 : index
    %46 = memref.load %arg4[%c2_19, %c1_20] : memref<4x6xf32, #tpu.memory_space<smem>>
    %47 = vector.extract_strided_slice %5 {offsets = [2, 0, 0], sizes = [1, 2, 128], strides = [1, 1, 1]} : vector<4x2x128xf32> to vector<1x2x128xf32>
    %48 = vector.shape_cast %47 : vector<1x2x128xf32> to vector<2x128xf32>
    %49 = vector.broadcast %46 : f32 to vector<2x128xf32>
    %50 = arith.mulf %49, %48 : vector<2x128xf32>
    %51 = arith.addf %45, %50 : vector<2x128xf32>
    %c3_21 = arith.constant 3 : index
    %c1_22 = arith.constant 1 : index
    %52 = memref.load %arg4[%c3_21, %c1_22] : memref<4x6xf32, #tpu.memory_space<smem>>
    %53 = vector.extract_strided_slice %5 {offsets = [3, 0, 0], sizes = [1, 2, 128], strides = [1, 1, 1]} : vector<4x2x128xf32> to vector<1x2x128xf32>
    %54 = vector.shape_cast %53 : vector<1x2x128xf32> to vector<2x128xf32>
    %55 = vector.broadcast %52 : f32 to vector<2x128xf32>
    %56 = arith.mulf %55, %54 : vector<2x128xf32>
    %57 = arith.addf %51, %56 : vector<2x128xf32>
    %c1_23 = arith.constant 1 : index
    %58 = memref.load %arg5[%c1_23] : memref<6xf32, #tpu.memory_space<smem>>
    %59 = vector.broadcast %58 : f32 to vector<2x128xf32>
    %60 = arith.addf %57, %59 : vector<2x128xf32>
    %c0_24 = arith.constant 0 : index
    %c1_25 = arith.constant 1 : index
    %c0_26 = arith.constant 0 : index
    %c0_27 = arith.constant 0 : index
    %61 = vector.load %arg6[%c0_24, %c1_25, %c0_26, %c0_27] : memref<1x6x2x128xf32, #tpu.memory_space<vmem>>, vector<1x1x2x128xf32>
    %62 = vector.shape_cast %61 : vector<1x1x2x128xf32> to vector<2x128xf32>
    %63 = vector.shape_cast %60 : vector<2x128xf32> to vector<1x1x2x128xf32>
    tpu.vector_store %arg6[%c0_24, %c1_25, %c0_26, %c0_27], %63 {strides = array<i32>} : memref<1x6x2x128xf32, #tpu.memory_space<vmem>>, vector<1x1x2x128xf32>,
    %c0_28 = arith.constant 0 : index
    %c2_29 = arith.constant 2 : index
    %64 = memref.load %arg4[%c0_28, %c2_29] : memref<4x6xf32, #tpu.memory_space<smem>>
    %65 = vector.extract_strided_slice %5 {offsets = [0, 0, 0], sizes = [1, 2, 128], strides = [1, 1, 1]} : vector<4x2x128xf32> to vector<1x2x128xf32>
    %66 = vector.shape_cast %65 : vector<1x2x128xf32> to vector<2x128xf32>
    %67 = vector.broadcast %64 : f32 to vector<2x128xf32>
    %68 = arith.mulf %67, %66 : vector<2x128xf32>
    %c1_30 = arith.constant 1 : index
    %c2_31 = arith.constant 2 : index
    %69 = memref.load %arg4[%c1_30, %c2_31] : memref<4x6xf32, #tpu.memory_space<smem>>
    %70 = vector.extract_strided_slice %5 {offsets = [1, 0, 0], sizes = [1, 2, 128], strides = [1, 1, 1]} : vector<4x2x128xf32> to vector<1x2x128xf32>
    %71 = vector.shape_cast %70 : vector<1x2x128xf32> to vector<2x128xf32>
    %72 = vector.broadcast %69 : f32 to vector<2x128xf32>
    %73 = arith.mulf %72, %71 : vector<2x128xf32>
    %74 = arith.addf %68, %73 : vector<2x128xf32>
    %c2_32 = arith.constant 2 : index
    %c2_33 = arith.constant 2 : index
    %75 = memref.load %arg4[%c2_32, %c2_33] : memref<4x6xf32, #tpu.memory_space<smem>>
    %76 = vector.extract_strided_slice %5 {offsets = [2, 0, 0], sizes = [1, 2, 128], strides = [1, 1, 1]} : vector<4x2x128xf32> to vector<1x2x128xf32>
    %77 = vector.shape_cast %76 : vector<1x2x128xf32> to vector<2x128xf32>
    %78 = vector.broadcast %75 : f32 to vector<2x128xf32>
    %79 = arith.mulf %78, %77 : vector<2x128xf32>
    %80 = arith.addf %74, %79 : vector<2x128xf32>
    %c3_34 = arith.constant 3 : index
    %c2_35 = arith.constant 2 : index
    %81 = memref.load %arg4[%c3_34, %c2_35] : memref<4x6xf32, #tpu.memory_space<smem>>
    %82 = vector.extract_strided_slice %5 {offsets = [3, 0, 0], sizes = [1, 2, 128], strides = [1, 1, 1]} : vector<4x2x128xf32> to vector<1x2x128xf32>
    %83 = vector.shape_cast %82 : vector<1x2x128xf32> to vector<2x128xf32>
    %84 = vector.broadcast %81 : f32 to vector<2x128xf32>
    %85 = arith.mulf %84, %83 : vector<2x128xf32>
    %86 = arith.addf %80, %85 : vector<2x128xf32>
    %c2_36 = arith.constant 2 : index
    %87 = memref.load %arg5[%c2_36] : memref<6xf32, #tpu.memory_space<smem>>
    %88 = vector.broadcast %87 : f32 to vector<2x128xf32>
    %89 = arith.addf %86, %88 : vector<2x128xf32>
    %c0_37 = arith.constant 0 : index
    %c2_38 = arith.constant 2 : index
    %c0_39 = arith.constant 0 : index
    %c0_40 = arith.constant 0 : index
    %90 = vector.load %arg6[%c0_37, %c2_38, %c0_39, %c0_40] : memref<1x6x2x128xf32, #tpu.memory_space<vmem>>, vector<1x1x2x128xf32>
    %91 = vector.shape_cast %90 : vector<1x1x2x128xf32> to vector<2x128xf32>
    %92 = vector.shape_cast %89 : vector<2x128xf32> to vector<1x1x2x128xf32>
    tpu.vector_store %arg6[%c0_37, %c2_38, %c0_39, %c0_40], %92 {strides = array<i32>} : memref<1x6x2x128xf32, #tpu.memory_space<vmem>>, vector<1x1x2x128xf32>,
    %c0_41 = arith.constant 0 : index
    %c3_42 = arith.constant 3 : index
    %93 = memref.load %arg4[%c0_41, %c3_42] : memref<4x6xf32, #tpu.memory_space<smem>>
    %94 = vector.extract_strided_slice %5 {offsets = [0, 0, 0], sizes = [1, 2, 128], strides = [1, 1, 1]} : vector<4x2x128xf32> to vector<1x2x128xf32>
    %95 = vector.shape_cast %94 : vector<1x2x128xf32> to vector<2x128xf32>
    %96 = vector.broadcast %93 : f32 to vector<2x128xf32>
    %97 = arith.mulf %96, %95 : vector<2x128xf32>
    %c1_43 = arith.constant 1 : index
    %c3_44 = arith.constant 3 : index
    %98 = memref.load %arg4[%c1_43, %c3_44] : memref<4x6xf32, #tpu.memory_space<smem>>
    %99 = vector.extract_strided_slice %5 {offsets = [1, 0, 0], sizes = [1, 2, 128], strides = [1, 1, 1]} : vector<4x2x128xf32> to vector<1x2x128xf32>
    %100 = vector.shape_cast %99 : vector<1x2x128xf32> to vector<2x128xf32>
    %101 = vector.broadcast %98 : f32 to vector<2x128xf32>
    %102 = arith.mulf %101, %100 : vector<2x128xf32>
    %103 = arith.addf %97, %102 : vector<2x128xf32>
    %c2_45 = arith.constant 2 : index
    %c3_46 = arith.constant 3 : index
    %104 = memref.load %arg4[%c2_45, %c3_46] : memref<4x6xf32, #tpu.memory_space<smem>>
    %105 = vector.extract_strided_slice %5 {offsets = [2, 0, 0], sizes = [1, 2, 128], strides = [1, 1, 1]} : vector<4x2x128xf32> to vector<1x2x128xf32>
    %106 = vector.shape_cast %105 : vector<1x2x128xf32> to vector<2x128xf32>
    %107 = vector.broadcast %104 : f32 to vector<2x128xf32>
    %108 = arith.mulf %107, %106 : vector<2x128xf32>
    %109 = arith.addf %103, %108 : vector<2x128xf32>
    %c3_47 = arith.constant 3 : index
    %c3_48 = arith.constant 3 : index
    %110 = memref.load %arg4[%c3_47, %c3_48] : memref<4x6xf32, #tpu.memory_space<smem>>
    %111 = vector.extract_strided_slice %5 {offsets = [3, 0, 0], sizes = [1, 2, 128], strides = [1, 1, 1]} : vector<4x2x128xf32> to vector<1x2x128xf32>
    %112 = vector.shape_cast %111 : vector<1x2x128xf32> to vector<2x128xf32>
    %113 = vector.broadcast %110 : f32 to vector<2x128xf32>
    %114 = arith.mulf %113, %112 : vector<2x128xf32>
    %115 = arith.addf %109, %114 : vector<2x128xf32>
    %c3_49 = arith.constant 3 : index
    %116 = memref.load %arg5[%c3_49] : memref<6xf32, #tpu.memory_space<smem>>
    %117 = vector.broadcast %116 : f32 to vector<2x128xf32>
    %118 = arith.addf %115, %117 : vector<2x128xf32>
    %c0_50 = arith.constant 0 : index
    %c3_51 = arith.constant 3 : index
    %c0_52 = arith.constant 0 : index
    %c0_53 = arith.constant 0 : index
    %119 = vector.load %arg6[%c0_50, %c3_51, %c0_52, %c0_53] : memref<1x6x2x128xf32, #tpu.memory_space<vmem>>, vector<1x1x2x128xf32>
    %120 = vector.shape_cast %119 : vector<1x1x2x128xf32> to vector<2x128xf32>
    %121 = vector.shape_cast %118 : vector<2x128xf32> to vector<1x1x2x128xf32>
    tpu.vector_store %arg6[%c0_50, %c3_51, %c0_52, %c0_53], %121 {strides = array<i32>} : memref<1x6x2x128xf32, #tpu.memory_space<vmem>>, vector<1x1x2x128xf32>,
    %c0_54 = arith.constant 0 : index
    %c4 = arith.constant 4 : index
    %122 = memref.load %arg4[%c0_54, %c4] : memref<4x6xf32, #tpu.memory_space<smem>>
    %123 = vector.extract_strided_slice %5 {offsets = [0, 0, 0], sizes = [1, 2, 128], strides = [1, 1, 1]} : vector<4x2x128xf32> to vector<1x2x128xf32>
    %124 = vector.shape_cast %123 : vector<1x2x128xf32> to vector<2x128xf32>
    %125 = vector.broadcast %122 : f32 to vector<2x128xf32>
    %126 = arith.mulf %125, %124 : vector<2x128xf32>
    %c1_55 = arith.constant 1 : index
    %c4_56 = arith.constant 4 : index
    %127 = memref.load %arg4[%c1_55, %c4_56] : memref<4x6xf32, #tpu.memory_space<smem>>
    %128 = vector.extract_strided_slice %5 {offsets = [1, 0, 0], sizes = [1, 2, 128], strides = [1, 1, 1]} : vector<4x2x128xf32> to vector<1x2x128xf32>
    %129 = vector.shape_cast %128 : vector<1x2x128xf32> to vector<2x128xf32>
    %130 = vector.broadcast %127 : f32 to vector<2x128xf32>
    %131 = arith.mulf %130, %129 : vector<2x128xf32>
    %132 = arith.addf %126, %131 : vector<2x128xf32>
    %c2_57 = arith.constant 2 : index
    %c4_58 = arith.constant 4 : index
    %133 = memref.load %arg4[%c2_57, %c4_58] : memref<4x6xf32, #tpu.memory_space<smem>>
    %134 = vector.extract_strided_slice %5 {offsets = [2, 0, 0], sizes = [1, 2, 128], strides = [1, 1, 1]} : vector<4x2x128xf32> to vector<1x2x128xf32>
    %135 = vector.shape_cast %134 : vector<1x2x128xf32> to vector<2x128xf32>
    %136 = vector.broadcast %133 : f32 to vector<2x128xf32>
    %137 = arith.mulf %136, %135 : vector<2x128xf32>
    %138 = arith.addf %132, %137 : vector<2x128xf32>
    %c3_59 = arith.constant 3 : index
    %c4_60 = arith.constant 4 : index
    %139 = memref.load %arg4[%c3_59, %c4_60] : memref<4x6xf32, #tpu.memory_space<smem>>
    %140 = vector.extract_strided_slice %5 {offsets = [3, 0, 0], sizes = [1, 2, 128], strides = [1, 1, 1]} : vector<4x2x128xf32> to vector<1x2x128xf32>
    %141 = vector.shape_cast %140 : vector<1x2x128xf32> to vector<2x128xf32>
    %142 = vector.broadcast %139 : f32 to vector<2x128xf32>
    %143 = arith.mulf %142, %141 : vector<2x128xf32>
    %144 = arith.addf %138, %143 : vector<2x128xf32>
    %c4_61 = arith.constant 4 : index
    %145 = memref.load %arg5[%c4_61] : memref<6xf32, #tpu.memory_space<smem>>
    %146 = vector.broadcast %145 : f32 to vector<2x128xf32>
    %147 = arith.addf %144, %146 : vector<2x128xf32>
    %c0_62 = arith.constant 0 : index
    %c4_63 = arith.constant 4 : index
    %c0_64 = arith.constant 0 : index
    %c0_65 = arith.constant 0 : index
    %148 = vector.load %arg6[%c0_62, %c4_63, %c0_64, %c0_65] : memref<1x6x2x128xf32, #tpu.memory_space<vmem>>, vector<1x1x2x128xf32>
    %149 = vector.shape_cast %148 : vector<1x1x2x128xf32> to vector<2x128xf32>
    %150 = vector.shape_cast %147 : vector<2x128xf32> to vector<1x1x2x128xf32>
    tpu.vector_store %arg6[%c0_62, %c4_63, %c0_64, %c0_65], %150 {strides = array<i32>} : memref<1x6x2x128xf32, #tpu.memory_space<vmem>>, vector<1x1x2x128xf32>,
    %c0_66 = arith.constant 0 : index
    %c5 = arith.constant 5 : index
    %151 = memref.load %arg4[%c0_66, %c5] : memref<4x6xf32, #tpu.memory_space<smem>>
    %152 = vector.extract_strided_slice %5 {offsets = [0, 0, 0], sizes = [1, 2, 128], strides = [1, 1, 1]} : vector<4x2x128xf32> to vector<1x2x128xf32>
    %153 = vector.shape_cast %152 : vector<1x2x128xf32> to vector<2x128xf32>
    %154 = vector.broadcast %151 : f32 to vector<2x128xf32>
    %155 = arith.mulf %154, %153 : vector<2x128xf32>
    %c1_67 = arith.constant 1 : index
    %c5_68 = arith.constant 5 : index
    %156 = memref.load %arg4[%c1_67, %c5_68] : memref<4x6xf32, #tpu.memory_space<smem>>
    %157 = vector.extract_strided_slice %5 {offsets = [1, 0, 0], sizes = [1, 2, 128], strides = [1, 1, 1]} : vector<4x2x128xf32> to vector<1x2x128xf32>
    %158 = vector.shape_cast %157 : vector<1x2x128xf32> to vector<2x128xf32>
    %159 = vector.broadcast %156 : f32 to vector<2x128xf32>
    %160 = arith.mulf %159, %158 : vector<2x128xf32>
    %161 = arith.addf %155, %160 : vector<2x128xf32>
    %c2_69 = arith.constant 2 : index
    %c5_70 = arith.constant 5 : index
    %162 = memref.load %arg4[%c2_69, %c5_70] : memref<4x6xf32, #tpu.memory_space<smem>>
    %163 = vector.extract_strided_slice %5 {offsets = [2, 0, 0], sizes = [1, 2, 128], strides = [1, 1, 1]} : vector<4x2x128xf32> to vector<1x2x128xf32>
    %164 = vector.shape_cast %163 : vector<1x2x128xf32> to vector<2x128xf32>
    %165 = vector.broadcast %162 : f32 to vector<2x128xf32>
    %166 = arith.mulf %165, %164 : vector<2x128xf32>
    %167 = arith.addf %161, %166 : vector<2x128xf32>
    %c3_71 = arith.constant 3 : index
    %c5_72 = arith.constant 5 : index
    %168 = memref.load %arg4[%c3_71, %c5_72] : memref<4x6xf32, #tpu.memory_space<smem>>
    %169 = vector.extract_strided_slice %5 {offsets = [3, 0, 0], sizes = [1, 2, 128], strides = [1, 1, 1]} : vector<4x2x128xf32> to vector<1x2x128xf32>
    %170 = vector.shape_cast %169 : vector<1x2x128xf32> to vector<2x128xf32>
    %171 = vector.broadcast %168 : f32 to vector<2x128xf32>
    %172 = arith.mulf %171, %170 : vector<2x128xf32>
    %173 = arith.addf %167, %172 : vector<2x128xf32>
    %c5_73 = arith.constant 5 : index
    %174 = memref.load %arg5[%c5_73] : memref<6xf32, #tpu.memory_space<smem>>
    %175 = vector.broadcast %174 : f32 to vector<2x128xf32>
    %176 = arith.addf %173, %175 : vector<2x128xf32>
    %c0_74 = arith.constant 0 : index
    %c5_75 = arith.constant 5 : index
    %c0_76 = arith.constant 0 : index
    %c0_77 = arith.constant 0 : index
    %177 = vector.load %arg6[%c0_74, %c5_75, %c0_76, %c0_77] : memref<1x6x2x128xf32, #tpu.memory_space<vmem>>, vector<1x1x2x128xf32>
    %178 = vector.shape_cast %177 : vector<1x1x2x128xf32> to vector<2x128xf32>
    %179 = vector.shape_cast %176 : vector<2x128xf32> to vector<1x1x2x128xf32>
    tpu.vector_store %arg6[%c0_74, %c5_75, %c0_76, %c0_77], %179 {strides = array<i32>} : memref<1x6x2x128xf32, #tpu.memory_space<vmem>>, vector<1x1x2x128xf32>,
    return
  }
  func.func @transform_0(%arg0: i32, %arg1: i32) -> (i32, i32, i32, i32) {
    %c0_i32 = arith.constant 0 : i32
    %c0_i32_0 = arith.constant 0 : i32
    %c0_i32_1 = arith.constant 0 : i32
    return %arg0, %c0_i32, %arg1, %c0_i32_0 : i32, i32, i32, i32
  }
  func.func @transform_1(%arg0: i32, %arg1: i32) -> (i32, i32) {
    %c0_i32 = arith.constant 0 : i32
    %c0_i32_0 = arith.constant 0 : i32
    return %arg1, %c0_i32 : i32, i32
  }
  func.func @transform_2(%arg0: i32, %arg1: i32) -> (i32, i32) {
    %c0_i32 = arith.constant 0 : i32
    %c0_i32_0 = arith.constant 0 : i32
    %c0_i32_1 = arith.constant 0 : i32
    return %c0_i32, %c0_i32_0 : i32, i32
  }
  func.func @transform_3(%arg0: i32, %arg1: i32) -> i32 {
    %c0_i32 = arith.constant 0 : i32
    %c0_i32_0 = arith.constant 0 : i32
    return %c0_i32 : i32
  }
  func.func @transform_4(%arg0: i32, %arg1: i32) -> (i32, i32, i32, i32) {
    %c0_i32 = arith.constant 0 : i32
    %c0_i32_0 = arith.constant 0 : i32
    %c0_i32_1 = arith.constant 0 : i32
    return %arg0, %c0_i32, %arg1, %c0_i32_0 : i32, i32, i32, i32
  }
}

</mosaic_0001>

<bundles_post_ra>
// kernel: tpu_custom_call.1
= control target key start
LH: loop header
LB: loop body
LE: loop exit
PB: predicated region body
PF: predicated region fallthrough
CT: control target
= control target key end

     0   :  { %s1141_s0 = inlined_call_operand.hbm [shape: f32[2,4,2,128], index: 0, kind: input, shape index: {}]   ;;  %s1142_s1 = inlined_call_operand.hbm [shape: f32[2,128], index: 1, kind: input, shape index: {}]   ;;  %s1143_s2 = inlined_call_operand.hbm [shape: f32[4,6], index: 2, kind: input, shape index: {}]   ;;  %s1144_s3 = inlined_call_operand.vmem [shape: f32[6], index: 3, kind: input, shape index: {}]   ;;  %s1145_s4 = inlined_call_operand.hbm [shape: f32[2,6,2,128], index: 4, kind: output, shape index: {}]  }
   0x1   :  { %1146 = sst [smem:[#allocation17_spill]] %s1142_s1 }
   0x2   :  { %1147 = sst [smem:[#allocation18_spill]] %s1143_s2 }
   0x3   :  { %9 = vsyncpa [#allocation3], 0 }
   0x4   :  { %11 = vsyncpa [#allocation3 + $0x1], 0 }
   0x5   :  { %12 = vsyncpa [#allocation8], 0 }
   0x6   :  { %13 = vsyncpa [#allocation5], 0 }
   0x7   :  { %14 = vsyncpa [#allocation6], 0 }
   0x8   :  { %15 = vsyncpa [#allocation4], 0 }
   0x9   :  { %17 = vsyncpa [#allocation4 + $0x1], 0  ;;  %s919_s15 = smov 0   ;;  %s921_s16 = smov 0  }
   0xa   :  { %s923_s17 = smov 0   ;;  %s925_s18 = smov 0  }
   0xb   :  { %s927_s19 = smov 0   ;;  %s929_s20 = smov 0  }
   0xc LB: > { %s550_s21 = sadd.s32 4294967295, %s885_s20   ;;  %s551_s22 = sadd.s32 4294967294, %s885_s20   ;;  %s885_s20 = sphi %s929_s20, %s23_s20   ;;  %s881_s19 = sphi %s927_s19, %s1161_s19   ;;  %s877_s18 = sphi %s925_s18, %s1160_s18   ;;  %s873_s17 = sphi %s923_s17, %s1159_s17   ;;  %s869_s16 = sphi %s921_s16, %s1158_s16   ;;  %s865_s15 = sphi %s919_s15, %s1157_s15  }
   0xd   : > { %p57_p0 = scmp.ne.s32.totalorder %s869_s16, %s865_s15  ;;  %p953_p1 = scmp.eq.s32.totalorder %s550_s21, 0 }
   0xe   : > { %p957_p2 = scmp.eq.s32.totalorder %s550_s21, 1  ;;  %p157_p3 = scmp.eq.s32.totalorder %s551_s22, 1 }
   0xf   : > { %p963_p4 = por %p953_p1, %p57_p0  ;;  %p552_p5 = scmp.ge.s32.totalorder %s885_s20, 1 }
  0x10   : > { %p968_p6 = por %p157_p3, %p57_p0  ;;  %p164_p7 = scmp.lt.s32.totalorder %s885_s20, 3 }
  0x11   : > { %s1152_s1 = sld [smem:[#allocation17_spill]]  ;;  %p556_p9 = scmp.ge.s32.totalorder %s885_s20, 2 }
  0x12   : > { %p976_p8 = pnand %p552_p5, %p164_p7  ;;  %s887_s5 = smov [#allocation7]  }
  0x13   : > { %s180_s6 = sshll.u32 %s887_s5, 4  ;;  %s1154_s2 = sld [smem:[#allocation18_spill]]  ;;  %s181_s6 = int_to_ptr.vmem [resolvable:$true] %s180_s6 }
  0x14   : > { %p620_p10 = pneg %p976_p8  ;;  %s200_s12 = sshll.u32 %s1144_s3, 4  ;;  %s201_s12 = int_to_ptr.vmem [resolvable:$true] %s200_s12 }
  0x15   : > { %s888_s13 = smov [#allocation9]   ;;  %s889_s14 = smov [#allocation10]  }
  0x16   : > { %p621_p11 = pnand %p620_p10, %p953_p1  ;;  %s44_s21 = sadd.s32 1, %s873_s17 }
  0x17   : > { %s178_s29 = sshll.u32 %s1152_s1, 4  ;;  %s35_s22 = sadd.s32 1, %s881_s19  ;;  %s179_s29 = int_to_ptr.hbm [resolvable:$true] %s178_s29 }
  0x18   : > { %623 = dma.hbm_to_vmem [thread:$0]  (!%p621_p11), %s179_s29, 32, %s181_s6, [#allocation8]  }
  0x19   : > { %s190_s9 = sshll.u32 %s1154_s2, 4  ;;  %p51_p12 = scmp.ne.s32.totalorder %s873_s17, %s869_s16  ;;  %s191_s9 = int_to_ptr.hbm [resolvable:$true] %s190_s9 }
  0x1a   : > { %626 = dma.hbm_to_smem (!%p621_p11), %s191_s9, 64, %s888_s13, [#allocation5]  }
  0x1b   : > { %629 = dma.vmem_to_smem (!%p621_p11), %s201_s12, 16, %s889_s14, [#allocation6]  }
  0x1c   : > { %p37_p13 = scmp.ge.s32.totalorder %s35_s22, 2  ;;  %p52_p0 = scmp.eq.s32.totalorder %s885_s20, 0 }
  0x1d   : > { %p998_p3 = por %p957_p2, %p51_p12  ;;  %p641_p5 = scmp.lt.s32.totalorder %s885_s20, 2 }
  0x1e   : > { %s1163_s22 = smov (%p37_p13, %s35_s22), 0  ;;  %p1005_p7 = por %p52_p0, %p51_p12 }
  0x1f   : > { %s211_s29 = sand.u32 1, %s873_s17   ;;  %s39_s5 = ssub.s32 %s881_s19, %s1163_s22 }
  0x20   : > { %p42_p10 = scmp.eq.s32.totalorder %s39_s5, 0  ;;  %s557_s6 = sshll.u32 %s211_s29, 3 }
  0x21   : > { %s601_s7 = sshll.u32 %s881_s19, 3  ;;  %s215_s11 = scalar_lea.vmem [#allocation2], %s557_s6 }
  0x22   : > { %s1014_s24 = scalar_select %p42_p10, %s873_s17, %s44_s21  }
  0x23   : > { %s221_s10 = scalar_lea.hbm %s1141_s0, %s601_s7  ;;  %s224_s12 = sshll.u32 %s215_s11, 4  ;;  %s225_s12 = int_to_ptr.vmem [resolvable:$true] %s224_s12 }
  0x24   : > { %s222_s13 = sshll.u32 %s221_s10, 4  ;;  %p631_p2 = pnand %p641_p5, %p1005_p7  ;;  %s223_s13 = int_to_ptr.hbm [resolvable:$true] %s222_s13 }
  0x25   : > { %s212_s14 = scalar_lea.sflag [#allocation3], %s211_s29  ;;  %s890_s1 = smov 32  }
  0x26   : > { %s891_s2 = smov 2   ;;  %236 = sbr.rel (%p976_p8) target bundleno = 99 (0x63), region = 36 }
  0x27   : > { %633 = dma.hbm_to_vmem [thread:$0]  (!%p631_p2), %s223_s13, 128, %s225_s12, %s212_s14, %s890_s1, %s890_s1, %s891_s2  }
  0x28   : > { %s1026_s21 = sand.u32 (!%p976_p8), 1, %s869_s16  }
  0x29   : > { %s561_s5 = sshll.u32 (!%p976_p8), %s1026_s21, 3  ;;  %s239_s6 = scalar_lea.sflag (!%p976_p8), [#allocation3], %s1026_s21 }
  0x2a   : > { %s242_s7 = scalar_lea.vmem (!%p976_p8), [#allocation2], %s561_s5 }
  0x2b   : > { %844 = dma.done.wait (%p963_p4), %s239_s6, 128  }
  0x2c   : > { %846 = vsyncadd (%p963_p4), %s239_s6, 4294967168 }
  0x2d   : > { %848 = dma.done.wait (%p953_p1), [#allocation8], 32  }
  0x2e   : > { %850 = vsyncadd (%p953_p1), [#allocation8], 4294967264 }
  0x2f   : > { %852 = dma.done.wait (%p953_p1), [#allocation5], 64  }
  0x30   : > { %854 = vsyncadd (%p953_p1), [#allocation5], 4294967232 }
  0x31   : > { %856 = dma.done.wait (%p953_p1), [#allocation6], 16  }
  0x32   : > { %858 = vsyncadd (%p953_p1), [#allocation6], 4294967280 }
  0x33   : > { %263 = sfence }
  0x34   : > { %v284_v0 = vld [vmem:[#allocation7] sm:$0x3]  ;;  %v285_v1 = vld [vmem:[%s242_s7] sm:$0x3]  ;;  %s293_s1 = sld [smem:[#allocation9]]  ;;  %s602_s12 = smul.u32 12, %s1026_s21 }
  0x35   : > { %v286_v2 = vld [vmem:[%s242_s7 + $0x2] sm:$0x3]  ;;  %s565_s2 = sld [smem:[#allocation9 + $0x80]]  ;;  %v287_v3 = vld [vmem:[%s242_s7 + $0x4] sm:$0x3]  ;;  %v1046_v5 = vmul.f32 %v285_v1, %v284_v0 }
  0x36   : > { %s566_s25 = sld [smem:[#allocation9 + $0x100]]  ;;  %v288_v4 = vld [vmem:[%s242_s7 + $0x6] sm:$0x3]  ;;  %v1048_v6 = vmul.f32 %v286_v2, %v284_v0  ;;  %v1052_v7 = vmul.f32 %v287_v3, %v284_v0 }
  0x37   : > { %s567_s30 = sld [smem:[#allocation9 + $0x180]]  ;;  %v1054_v8 = vmul.f32 %v288_v4, %v284_v0 }
  0x38   : > { %s1050_s28 = sld [smem:[#allocation10]] }
  0x39   : > { %s568_s23 = sld [smem:[#allocation9 + $0x1]] }
  0x3a   : > { %v294_v9 = vstv %s293_s1  ;;  %s569_s29 = sld [smem:[#allocation9 + $0x81]] }
  0x3b   : > { %v295_v10 = vmul.f32 %v294_v9, %v1046_v5  ;;  %v297_v11 = vstv %s565_s2  ;;  %s570_s8 = sld [smem:[#allocation9 + $0x101]] }
  0x3c   : > { %v298_v12 = vmul.f32 %v297_v11, %v1048_v6  ;;  %v301_v13 = vstv %s566_s25  ;;  %s571_s9 = sld [smem:[#allocation9 + $0x181]]  ;;  %s1071_s25 = scalar_lea.vmem [#allocation11], %s602_s12 }
  0x3d   : > { %v302_v14 = vmul.f32 %v301_v13, %v1052_v7  ;;  %v305_v15 = vstv %s567_s30  ;;  %s1059_s10 = sld [smem:[#allocation10 + $0x1]] }
  0x3e   : > { %v299_v16 = vadd.f32 %v298_v12, %v295_v10  ;;  %v306_v17 = vmul.f32 %v305_v15, %v1054_v8  ;;  %s574_s11 = sld [smem:[#allocation9 + $0x2]]  ;;  %v309_v22 = vstv %s1050_s28 }
  0x3f   : > { %v313_v18 = vstv %s568_s23  ;;  %s575_s13 = sld [smem:[#allocation9 + $0x82]] }
  0x40   : > { %v303_v19 = vadd.f32 %v302_v14, %v299_v16  ;;  %v314_v20 = vmul.f32 %v313_v18, %v1046_v5  ;;  %v316_v21 = vstv %s569_s29  ;;  %s576_s14 = sld [smem:[#allocation9 + $0x102]] }
  0x41   : > { %v317_v23 = vmul.f32 %v316_v21, %v1048_v6  ;;  %v320_v24 = vstv %s570_s8  ;;  %s577_s5 = sld [smem:[#allocation9 + $0x182]] }
  0x42   : > { %v307_v25 = vadd.f32 %v306_v17, %v303_v19  ;;  %v321_v26 = vmul.f32 %v320_v24, %v1052_v7  ;;  %v324_v27 = vstv %s571_s9  ;;  %s1067_s6 = sld [smem:[#allocation10 + $0x2]] }
  0x43   : > { %v318_v28 = vadd.f32 %v317_v23, %v314_v20  ;;  %v325_v29 = vmul.f32 %v324_v27, %v1054_v8  ;;  %s580_s7 = sld [smem:[#allocation9 + $0x3]]  ;;  %v328_v35 = vstv %s1059_s10 }
  0x44   : > { %v310_v30 = vadd.f32 %v309_v22, %v307_v25  ;;  %v333_v31 = vstv %s574_s11  ;;  %s581_s1 = sld [smem:[#allocation9 + $0x83]] }
  0x45   : > { %v322_v32 = vadd.f32 %v321_v26, %v318_v28  ;;  %v334_v33 = vmul.f32 %v333_v31, %v1046_v5  ;;  %v336_v34 = vstv %s575_s13  ;;  %s582_s2 = sld [smem:[#allocation9 + $0x103]] }
  0x46   : > { %311 = vst [vmem:[%s1071_s25] sm:$0x3] %v310_v30  ;;  %v337_v36 = vmul.f32 %v336_v34, %v1048_v6  ;;  %v340_v37 = vstv %s576_s14  ;;  %s583_s30 = sld [smem:[#allocation9 + $0x183]] }
  0x47   : > { %v326_v38 = vadd.f32 %v325_v29, %v322_v32  ;;  %v341_v39 = vmul.f32 %v340_v37, %v1052_v7  ;;  %v344_v40 = vstv %s577_s5  ;;  %s1077_s28 = sld [smem:[#allocation10 + $0x3]] }
  0x48   : > { %v338_v41 = vadd.f32 %v337_v36, %v334_v33  ;;  %v345_v42 = vmul.f32 %v344_v40, %v1054_v8  ;;  %s586_s23 = sld [smem:[#allocation9 + $0x4]]  ;;  %v348_v48 = vstv %s1067_s6  ;;  %s603_s6 = smul.u32 12, %s877_s18 }
  0x49   : > { %v329_v43 = vadd.f32 %v328_v35, %v326_v38  ;;  %v353_v44 = vstv %s580_s7  ;;  %s587_s29 = sld [smem:[#allocation9 + $0x84]] }
  0x4a   : > { %v342_v45 = vadd.f32 %v341_v39, %v338_v41  ;;  %v354_v46 = vmul.f32 %v353_v44, %v1046_v5  ;;  %v356_v47 = vstv %s581_s1  ;;  %s588_s8 = sld [smem:[#allocation9 + $0x104]]  ;;  %s425_s1 = scalar_lea.hbm %s1145_s4, %s603_s6 }
  0x4b   : > { %573 = vst [vmem:[%s1071_s25 + $0x2] sm:$0x3] %v329_v43  ;;  %v357_v49 = vmul.f32 %v356_v47, %v1048_v6  ;;  %v360_v50 = vstv %s582_s2  ;;  %s589_s9 = sld [smem:[#allocation9 + $0x184]]  ;;  %s426_s2 = sshll.u32 %s1071_s25, 4  ;;  %s427_s2 = int_to_ptr.vmem [resolvable:$true] %s426_s2 }
  0x4c   : > { %v346_v51 = vadd.f32 %v345_v42, %v342_v45  ;;  %v361_v52 = vmul.f32 %v360_v50, %v1052_v7  ;;  %v364_v53 = vstv %s583_s30  ;;  %s1085_s10 = sld [smem:[#allocation10 + $0x4]]  ;;  %s428_s30 = sshll.u32 %s425_s1, 4  ;;  %s429_s30 = int_to_ptr.hbm [resolvable:$true] %s428_s30 }
  0x4d   : > { %v358_v54 = vadd.f32 %v357_v49, %v354_v46  ;;  %v365_v55 = vmul.f32 %v364_v53, %v1054_v8  ;;  %s592_s11 = sld [smem:[#allocation9 + $0x5]]  ;;  %v368_v61 = vstv %s1077_s28  ;;  %s413_s28 = scalar_lea.sflag [#allocation4], %s1026_s21 }
  0x4e   : > { %v349_v56 = vadd.f32 %v348_v48, %v346_v51  ;;  %v373_v57 = vstv %s586_s23  ;;  %s593_s12 = sld [smem:[#allocation9 + $0x85]]  ;;  %s805_s23 = sshra.s32 %s429_s30, 4  ;;  %s806_s23 = int_to_ptr.hbm [resolvable:$true] %s805_s23 }
  0x4f   : > { %v362_v58 = vadd.f32 %v361_v52, %v358_v54  ;;  %v374_v59 = vmul.f32 %v373_v57, %v1046_v5  ;;  %v376_v60 = vstv %s587_s29  ;;  %s594_s13 = sld [smem:[#allocation9 + $0x105]]  ;;  %s807_s29 = scalar_lea.hbm %s806_s23, 12 }
  0x50   : > { %579 = vst [vmem:[%s1071_s25 + $0x4] sm:$0x3] %v349_v56  ;;  %v377_v62 = vmul.f32 %v376_v60, %v1048_v6  ;;  %v380_v63 = vstv %s588_s8  ;;  %s595_s14 = sld [smem:[#allocation9 + $0x185]]  ;;  %p808_p1 = scmp.ne.s32.totalorder %s806_s23, %s807_s29 }
  0x51   : > { %v366_v0 = vadd.f32 %v365_v55, %v362_v58  ;;  %v381_v1 = vmul.f32 %v380_v63, %v1052_v7  ;;  %v384_v2 = vstv %s589_s9  ;;  %s596_s5 = sld [smem:[#allocation10 + $0x5]]  ;;  %p812_p11 = scmp.lt.s32.totalorder %s806_s23, %s1145_s4 }
  0x52   : > { %v378_v3 = vadd.f32 %v377_v62, %v374_v59  ;;  %v385_v4 = vmul.f32 %v384_v2, %v1054_v8  ;;  %v388_v14 = vstv %s1085_s10  ;;  %p809_p4 = pnand %p808_p1, %p998_p3  ;;  %s811_s10 = scalar_lea.hbm %s1145_s4, 24 }
  0x53   : > { %v369_v9 = vadd.f32 %v368_v61, %v366_v0  ;;  %v393_v10 = vstv %s592_s11  ;;  %p813_p12 = scmp.lt.s32.totalorder %s811_s10, %s807_s29 }
  0x54   : > { %v382_v11 = vadd.f32 %v381_v1, %v378_v3  ;;  %v394_v12 = vmul.f32 %v393_v10, %v1046_v5  ;;  %v396_v13 = vstv %s593_s12  ;;  %p810_p8 = pneg %p809_p4 }
  0x55   : > { %585 = vst [vmem:[%s1071_s25 + $0x6] sm:$0x3] %v369_v9  ;;  %v397_v15 = vmul.f32 %v396_v13, %v1048_v6  ;;  %v400_v16 = vstv %s594_s13  ;;  %p814_p13 = por %p813_p12, %p812_p11 }
  0x56   : > { %v386_v17 = vadd.f32 %v385_v4, %v382_v11  ;;  %v401_v18 = vmul.f32 %v400_v16, %v1052_v7  ;;  %v404_v19 = vstv %s595_s14 }
  0x57   : > { %v398_v20 = vadd.f32 %v397_v15, %v394_v12  ;;  %v405_v21 = vmul.f32 %v404_v19, %v1054_v8  ;;  %v408_v6 = vstv %s596_s5  ;;  %p815_p0 = pnand %p814_p13, %p810_p8 }
  0x58   : > { %v389_v5 = vadd.f32 %v388_v14, %v386_v17 }
  0x59   : > { %v402_v22 = vadd.f32 %v401_v18, %v398_v20 }
  0x5a   : > { %591 = vst [vmem:[%s1071_s25 + $0x8] sm:$0x3] %v389_v5 }
  0x5b   : > { %v406_v23 = vadd.f32 %v405_v21, %v402_v22 }
  0x5d   : > { %v409_v24 = vadd.f32 %v408_v6, %v406_v23 }
  0x5f   : > { %597 = vst [vmem:[%s1071_s25 + $0xa] sm:$0x3] %v409_v24 }
  0x60   : > { %818 = shalt.err (!%p815_p0)
}
  0x61   : > { %s892_s21 = smov 32   ;;  %s893_s25 = smov 2  }
  0x62   : > { %618 = dma.vmem_to_hbm [thread:$0]  (%p998_p3), %s427_s2, 192, %s429_s30, %s413_s28, %s892_s21, %s892_s21, %s893_s25  }
  0x63 PF: > { %s443_s13 = sand.u32 1, %s865_s15   ;;  %p635_p5 = pnand %p556_p9, %p968_p6 }
  0x64   : > { %s444_s14 = scalar_lea.sflag [#allocation4], %s443_s13 }
  0x65   : > { %p636_p7 = pneg %p635_p5 }
  0x67   : > { %860 = dma.done.wait (%p636_p7), %s444_s14, 192  }
  0x68   : > { %862 = vsyncadd (%p636_p7), %s444_s14, 4294967104  ;;  %s23_s20 = sadd.s32 1, %s885_s20   ;;  %s1157_s15 = smov %s869_s16 }
  0x69   : > { %p20_p10 = scmp.ge.s32.totalorder %s23_s20, 4   ;;  %s1158_s16 = smov %s873_s17 }
  0x6a   : > { %s1159_s17 = smov %s1014_s24  ;;  %s1160_s18 = smov %s881_s19 }
  0x6b   : > { %s1161_s19 = smov %s1163_s22  ;;  %22 = sbr.rel (!%p20_p10) target bundleno = 12 (0xc), region = 101 }
  0x70   :  { %450 = vsyncpa [#allocation3], 1 }
  0x71   :  { %452 = vsyncpa [#allocation3 + $0x1], 1 }
  0x72   :  { %453 = vsyncpa [#allocation8], 1 }
  0x73   :  { %454 = vsyncpa [#allocation4], 1 }
  0x74   :  { %456 = vsyncpa [#allocation4 + $0x1], 1 }
  0x75   :  { %457 = vsyncpa [#allocation5], 1 }
  0x76   :  { %459 = vsyncpa [#allocation5 + $0x1], 1 }
  0x77   :  { %460 = vsyncpa [#allocation6], 1 }
  0x78   :  { %462 = vsyncpa [#allocation6 + $0x1], 1 }

</bundles_post_ra>
